<compile_context>
chip_gen: v7x
topology: tpu7x:2x2x1
jax: 0.10.0
libtpu: 0.0.40
codegen_flags: <defaults>
</compile_context>

<pallas_src>
import jax
import jax.numpy as jnp
from jax.experimental import pallas as pl
from jax.experimental.pallas import tpu as pltpu


def _sigmoid(x):
    # f32 exp goes to the EUP; exact reciprocal keeps 1e-5 parity with the ref.
    return 1.0 / (1.0 + jnp.exp(-x))


def _round_up(x, m):
    return ((x + m - 1) // m) * m


def _choose_tile_b(batch, max_tile_b=2048, min_grid=2):
    """Largest batch tile (multiple of 128, <= max_tile_b) keeping >= min_grid steps."""
    b_pad = _round_up(batch, 128)
    tile = max(128, (min(b_pad, max_tile_b) // 128) * 128)
    while tile > 128 and (b_pad + tile - 1) // tile < min_grid:
        tile = max(128, ((tile // 2) // 128) * 128)
    return tile


def deepfm_kernel(flatT_ref, wfused_ref, b1_ref, w2_ref, b2_ref, w3_ref,
                  b3_ref, out_ref):
    # flatT_ref:  (F*D, TILE_B)   batch on lanes (f32 or bf16)
    # wfused_ref: (D + H1, F*D)   rows [0:D] = FM block-sum, rows [D:] = W1^T
    h1_dim = b1_ref.shape[0]
    d = wfused_ref.shape[0] - h1_dim               # embedding dim D

    # --- single fused MXU pass over the shared activations ---
    # Operands keep their stored dtype (f32 or bf16); accumulation is f32.
    fused = jnp.dot(wfused_ref[...], flatT_ref[...],
                    preferred_element_type=jnp.float32)        # (D+H1, TILE_B)
    s = fused[:d, :]                                           # (D, TILE_B): sum_f e[b,f,:]
    h1 = jnp.maximum(fused[d:, :] + b1_ref[...], 0.0)          # (H1, TILE_B)

    # --- FM second-order term (all f32; cancellation-sensitive) ---
    flat_f32 = flatT_ref[...].astype(jnp.float32)
    sq_of_sum = jnp.sum(s * s, axis=0, keepdims=True)          # (1, TILE_B)
    sum_of_sq = jnp.sum(flat_f32 * flat_f32, axis=0, keepdims=True)
    fm = 0.5 * (sq_of_sum - sum_of_sq)                         # (1, TILE_B)

    # --- deep MLP (weights stored transposed: h = W^T @ x) ---
    h2 = jnp.maximum(
        jnp.dot(w2_ref[...], h1, preferred_element_type=jnp.float32)
        + b2_ref[...], 0.0)                                    # (H2, TILE_B)
    # Final Linear has output width 1 -> VPU mul + sublane reduce, not the MXU.
    logit = jnp.sum(h2 * w3_ref[...], axis=0, keepdims=True) + b3_ref[0, 0]
    deep = _sigmoid(logit)                                     # (1, TILE_B)

    # final: sigmoid(fm_out + deep_out); lane-dense store (broadcast to 8 sublanes)
    out = _sigmoid(fm + deep)                                  # (1, TILE_B)
    out_ref[...] = jnp.broadcast_to(out, out_ref.shape)        # (8, TILE_B)


def prepare_deepfm_params(w1, b1, w2, b2, w3, b3, *, emb_dim, n_fields,
                          activation_dtype=jnp.float32):
    """Build kernel-side weight layouts ONCE (hoisted off the per-call path)."""
    FD = emb_dim * n_fields
    H1 = w1.shape[1]
    H2 = w2.shape[1]
    assert w1.shape[0] == FD
    # The fused[:D]/fused[D:] sublane split must stay on an (8,128) tile boundary.
    assert emb_dim % 8 == 0, "emb_dim must be a multiple of 8"

    fsum_t = jnp.tile(jnp.eye(emb_dim, dtype=jnp.float32), (1, n_fields))   # (D, F*D)
    w_fused_t = jnp.concatenate([fsum_t, w1.T.astype(jnp.float32)],
                                axis=0).astype(activation_dtype)            # (D+H1, F*D)
    b1_col = b1.reshape(H1, 1).astype(jnp.float32)
    w2_t = w2.T.astype(jnp.float32)                                          # (H2, H1)
    b2_col = b2.reshape(H2, 1).astype(jnp.float32)
    w3_col = w3.reshape(H2, 1).astype(jnp.float32)
    b3_s = b3.reshape(1, 1).astype(jnp.float32)
    return (w_fused_t, b1_col, w2_t, b2_col, w3_col, b3_s)


def deepfm_pallas(flat_t, params, *, emb_dim, max_tile_b=2048):
    """flat_t: (F*D, B) gathered embeddings, batch on the lane (last) axis."""
    w_fused_t, b1_col, w2_t, b2_col, w3_col, b3_s = params
    FD, B = flat_t.shape
    H1 = b1_col.shape[0]
    H2 = b2_col.shape[0]
    assert FD % emb_dim == 0
    assert w_fused_t.shape == (emb_dim + H1, FD)

    # Activation stream follows the weight dtype (f32, or bf16 to halve HBM bytes).
    flat_t = flat_t.astype(w_fused_t.dtype)

    tile_b = _choose_tile_b(B, max_tile_b)
    b_pad = _round_up(B, tile_b)
    if b_pad != B:
        flat_t = jnp.pad(flat_t, ((0, 0), (0, b_pad - B)))
    grid = (b_pad // tile_b,)

    act_bytes = flat_t.dtype.itemsize
    cost = pl.CostEstimate(
        flops=2 * b_pad * (FD * (emb_dim + H1) + H1 * H2 + H2),
        transcendentals=2 * b_pad,
        bytes_accessed=(b_pad * FD * act_bytes
                        + w_fused_t.size * w_fused_t.dtype.itemsize
                        + (H1 + H2 * H1 + 2 * H2 + 1) * 4
                        + 8 * b_pad * 4),
    )

    out = pl.pallas_call(
        deepfm_kernel,
        out_shape=jax.ShapeDtypeStruct((8, b_pad), jnp.float32),
        grid=grid,
        in_specs=[
            pl.BlockSpec((FD, tile_b), lambda i: (0, i)),        # activations, tiled over batch
            pl.BlockSpec((emb_dim + H1, FD), lambda i: (0, 0)),  # fused [fsum | W1^T], resident
            pl.BlockSpec((H1, 1), lambda i: (0, 0)),             # b1
            pl.BlockSpec((H2, H1), lambda i: (0, 0)),            # W2^T
            pl.BlockSpec((H2, 1), lambda i: (0, 0)),             # b2
            pl.BlockSpec((H2, 1), lambda i: (0, 0)),             # w3 column
            pl.BlockSpec(memory_space=pltpu.MemorySpace.SMEM),   # b3 scalar
        ],
        out_specs=pl.BlockSpec((8, tile_b), lambda i: (0, i)),   # lane-dense output slab
        compiler_params=pltpu.CompilerParams(
            dimension_semantics=("parallel",),                   # shards grid across TCs
            vmem_limit_bytes=64 * 1024 * 1024,                   # working set ~12 MiB at tile 2048
        ),
        cost_estimate=cost,
    )(flat_t, w_fused_t, b1_col, w2_t, b2_col, w3_col, b3_s)
    return out[0, :B]                                            # (B,)


def make_deepfm_forward(emb_table, user_table, item_table, params, *,
                        emb_dim, max_tile_b=2048):
    """Jitted forward: (u, i) -> sigmoid(FMcross + Deep), matching the PyTorch module."""
    n_fields = user_table.shape[1] + item_table.shape[1]

    @jax.jit
    def forward(u, it):
        # __getAllFeatures + embedding gather (wrapper glue).
        idx = jnp.concatenate([user_table[u], item_table[it]], axis=1)   # (B, F)
        embs = emb_table[idx]                                            # (B, F, D)
        B = u.shape[0]
        # Emit the (F*D, B) batch-on-lanes layout directly from the gather so XLA
        # fuses gather + layout into one HBM write (no separate flat.T pass).
        flat_t = embs.transpose(1, 2, 0).reshape(n_fields * emb_dim, B)  # (F*D, B)
        return deepfm_pallas(flat_t, params, emb_dim=emb_dim,
                             max_tile_b=max_tile_b)

    return forward


if __name__ == "__main__":
    # small shapes consistent with the module
    B, D = 200, 32                    # batch, embedding dim (200 exercises padding)
    n_users, n_items = 10, 12
    Fu, Fi = 3, 5                     # user_df.shape[1], item_df.shape[1]
    F = Fu + Fi                       # total_neigbours
    n_features = 100
    H0, H1, H2 = F * D, (F * D) // 2, (F * D) // 4   # 256, 128, 64

    key = jax.random.PRNGKey(0)
    ks = jax.random.split(key, 8)

    # synthetic user_df / item_df: rows of feature indices
    user_table = jax.random.randint(ks[0], (n_users, Fu), 0, n_features, dtype=jnp.int32)
    item_table = jax.random.randint(ks[1], (n_items, Fi), 0, n_features, dtype=jnp.int32)

    # nn.Embedding(n_features, D, max_norm=1): pre-renormalize rows to norm <= 1
    emb = jax.random.normal(ks[2], (n_features, D), jnp.float32)
    norms = jnp.linalg.norm(emb, axis=1, keepdims=True)
    emb = emb * jnp.minimum(1.0, 1.0 / jnp.maximum(norms, 1e-7))

    def linear_init(k, fan_in, fan_out):
        kw, kb = jax.random.split(k)
        bound = 1.0 / float(fan_in) ** 0.5
        w = jax.random.uniform(kw, (fan_in, fan_out), jnp.float32, -bound, bound)
        b = jax.random.uniform(kb, (1, fan_out), jnp.float32, -bound, bound)
        return w, b

    w1, b1 = linear_init(ks[3], H0, H1)
    w2, b2 = linear_init(ks[4], H1, H2)
    w3, b3 = linear_init(ks[5], H2, 1)

    # batch of user / item ids
    u = jax.random.randint(ks[6], (B,), 0, n_users, dtype=jnp.int32)
    it = jax.random.randint(ks[7], (B,), 0, n_items, dtype=jnp.int32)

    # --- f32 path (exact parity with the reference) ---
    params_f32 = prepare_deepfm_params(w1, b1, w2, b2, w3, b3,
                                       emb_dim=D, n_fields=F,
                                       activation_dtype=jnp.float32)
    fwd_f32 = make_deepfm_forward(emb, user_table, item_table, params_f32,
                                  emb_dim=D, max_tile_b=2048)
    out = jax.block_until_ready(fwd_f32(u, it))                   # (B,)

    # pure-JAX reference (matches the PyTorch forward, incl. the double sigmoid)
    idx = jnp.concatenate([user_table[u], item_table[it]], axis=1)  # (B, F)
    embs = emb[idx]                                                 # (B, F, D)
    flat = embs.reshape(B, F * D)
    s_ref = embs.sum(axis=1)
    fm_ref = 0.5 * jnp.sum(s_ref * s_ref - (embs ** 2).sum(axis=1), axis=1)
    h1_ref = jax.nn.relu(flat @ w1 + b1)
    h2_ref = jax.nn.relu(h1_ref @ w2 + b2)
    deep_ref = jax.nn.sigmoid(h2_ref @ w3 + b3)[:, 0]
    ref = jax.nn.sigmoid(fm_ref + deep_ref)

    assert jnp.allclose(out, ref, atol=1e-5, rtol=1e-5), (out, ref)

    # --- optional bf16 activation/weight stream (halves HBM bytes on v6e/v7x);
    #     the cancellation-sensitive FM term no longer meets 1e-5, so use a
    #     deliberately relaxed tolerance here. ---
    params_bf16 = prepare_deepfm_params(w1, b1, w2, b2, w3, b3,
                                        emb_dim=D, n_fields=F,
                                        activation_dtype=jnp.bfloat16)
    fwd_bf16 = make_deepfm_forward(emb, user_table, item_table, params_bf16,
                                   emb_dim=D, max_tile_b=2048)
    out_bf16 = jax.block_until_ready(fwd_bf16(u, it))
    assert jnp.allclose(out_bf16, ref, atol=5e-2, rtol=5e-2), (out_bf16, ref)

    print("KERNEL_OK")
</pallas_src>

<mosaic_0001>
module attributes {stable_mosaic.version = 11 : i64} {
  func.func @deepfm_kernel(%arg0: i32, %arg1: memref<256x128xf32, #tpu.memory_space<vmem>>, %arg2: memref<160x256xf32, #tpu.memory_space<vmem>>, %arg3: memref<128x1xf32, #tpu.memory_space<vmem>>, %arg4: memref<64x128xf32, #tpu.memory_space<vmem>>, %arg5: memref<64x1xf32, #tpu.memory_space<vmem>>, %arg6: memref<64x1xf32, #tpu.memory_space<vmem>>, %arg7: memref<1x1xf32, #tpu.memory_space<smem>>, %arg8: memref<8x128xf32, #tpu.memory_space<vmem>>) attributes {dimension_semantics = [#tpu.dimension_semantics<parallel>], iteration_bounds = array<i64: 2>, scalar_prefetch = 0 : i64, scratch_operands = 0 : i64, tpu.core_type = #tpu.core_type<tc>, window_params = [{transform_indices = @transform_0, window_bounds = array<i64: 256, 128>}, {pipeline_mode = #tpu.pipeline_mode<synchronous>, transform_indices = @transform_1, window_bounds = array<i64: 160, 256>}, {pipeline_mode = #tpu.pipeline_mode<synchronous>, transform_indices = @transform_2, window_bounds = array<i64: 128, 1>}, {pipeline_mode = #tpu.pipeline_mode<synchronous>, transform_indices = @transform_3, window_bounds = array<i64: 64, 128>}, {pipeline_mode = #tpu.pipeline_mode<synchronous>, transform_indices = @transform_4, window_bounds = array<i64: 64, 1>}, {pipeline_mode = #tpu.pipeline_mode<synchronous>, transform_indices = @transform_5, window_bounds = array<i64: 64, 1>}, {transform_indices = @transform_6, window_bounds = array<i64: 1, 1>}, {transform_indices = @transform_7, window_bounds = array<i64: 8, 128>}]} {
    %c0 = arith.constant 0 : index
    %c0_0 = arith.constant 0 : index
    %0 = vector.load %arg2[%c0, %c0_0] : memref<160x256xf32, #tpu.memory_space<vmem>>, vector<160x256xf32>
    %c0_1 = arith.constant 0 : index
    %c0_2 = arith.constant 0 : index
    %1 = vector.load %arg1[%c0_1, %c0_2] : memref<256x128xf32, #tpu.memory_space<vmem>>, vector<256x128xf32>
    %cst = arith.constant dense<0.000000e+00> : vector<160x128xf32>
    %2 = tpu.matmul %0, %1, %cst {dimension_numbers = #tpu.dot_dimension_numbers<[1], [0], [0], [1], [0, 0, 1, 1], [], []>} : vector<160x256xf32>, vector<256x128xf32>, vector<160x128xf32> -> vector<160x128xf32>
    %3 = vector.extract_strided_slice %2 {offsets = [0, 0], sizes = [32, 128], strides = [1, 1]} : vector<160x128xf32> to vector<32x128xf32>
    %4 = vector.extract_strided_slice %2 {offsets = [32, 0], sizes = [128, 128], strides = [1, 1]} : vector<160x128xf32> to vector<128x128xf32>
    %c0_3 = arith.constant 0 : index
    %c0_4 = arith.constant 0 : index
    %5 = vector.load %arg3[%c0_3, %c0_4] : memref<128x1xf32, #tpu.memory_space<vmem>>, vector<128x1xf32>
    %6 = vector.broadcast %5 : vector<128x1xf32> to vector<128x128xf32>
    %7 = arith.addf %4, %6 : vector<128x128xf32>
    %cst_5 = arith.constant 0.000000e+00 : f32
    %8 = vector.broadcast %cst_5 : f32 to vector<128x128xf32>
    %9 = arith.maximumf %7, %8 : vector<128x128xf32>
    %c0_6 = arith.constant 0 : index
    %c0_7 = arith.constant 0 : index
    %10 = vector.load %arg1[%c0_6, %c0_7] : memref<256x128xf32, #tpu.memory_space<vmem>>, vector<256x128xf32>
    %11 = arith.mulf %3, %3 : vector<32x128xf32>
    %cst_8 = arith.constant dense<0.000000e+00> : vector<128xf32>
    %12 = vector.multi_reduction <add>, %11, %cst_8 [0] : vector<32x128xf32> to vector<128xf32>
    %13 = vector.shape_cast %12 : vector<128xf32> to vector<1x128xf32>
    %14 = arith.mulf %10, %10 : vector<256x128xf32>
    %cst_9 = arith.constant dense<0.000000e+00> : vector<128xf32>
    %15 = vector.multi_reduction <add>, %14, %cst_9 [0] : vector<256x128xf32> to vector<128xf32>
    %16 = vector.shape_cast %15 : vector<128xf32> to vector<1x128xf32>
    %17 = arith.subf %13, %16 : vector<1x128xf32>
    %cst_10 = arith.constant 5.000000e-01 : f32
    %18 = vector.broadcast %cst_10 : f32 to vector<1x128xf32>
    %19 = arith.mulf %18, %17 : vector<1x128xf32>
    %c0_11 = arith.constant 0 : index
    %c0_12 = arith.constant 0 : index
    %20 = vector.load %arg4[%c0_11, %c0_12] : memref<64x128xf32, #tpu.memory_space<vmem>>, vector<64x128xf32>
    %cst_13 = arith.constant dense<0.000000e+00> : vector<64x128xf32>
    %21 = tpu.matmul %20, %9, %cst_13 {dimension_numbers = #tpu.dot_dimension_numbers<[1], [0], [0], [1], [0, 0, 1, 1], [], []>} : vector<64x128xf32>, vector<128x128xf32>, vector<64x128xf32> -> vector<64x128xf32>
    %c0_14 = arith.constant 0 : index
    %c0_15 = arith.constant 0 : index
    %22 = vector.load %arg5[%c0_14, %c0_15] : memref<64x1xf32, #tpu.memory_space<vmem>>, vector<64x1xf32>
    %23 = vector.broadcast %22 : vector<64x1xf32> to vector<64x128xf32>
    %24 = arith.addf %21, %23 : vector<64x128xf32>
    %cst_16 = arith.constant 0.000000e+00 : f32
    %25 = vector.broadcast %cst_16 : f32 to vector<64x128xf32>
    %26 = arith.maximumf %24, %25 : vector<64x128xf32>
    %c0_17 = arith.constant 0 : index
    %c0_18 = arith.constant 0 : index
    %27 = vector.load %arg6[%c0_17, %c0_18] : memref<64x1xf32, #tpu.memory_space<vmem>>, vector<64x1xf32>
    %28 = vector.broadcast %27 : vector<64x1xf32> to vector<64x128xf32>
    %29 = arith.mulf %26, %28 : vector<64x128xf32>
    %cst_19 = arith.constant dense<0.000000e+00> : vector<128xf32>
    %30 = vector.multi_reduction <add>, %29, %cst_19 [0] : vector<64x128xf32> to vector<128xf32>
    %31 = vector.shape_cast %30 : vector<128xf32> to vector<1x128xf32>
    %c0_20 = arith.constant 0 : index
    %c0_21 = arith.constant 0 : index
    %32 = memref.load %arg7[%c0_20, %c0_21] : memref<1x1xf32, #tpu.memory_space<smem>>
    %33 = vector.broadcast %32 : f32 to vector<1x128xf32>
    %34 = arith.addf %31, %33 : vector<1x128xf32>
    %cst_22 = arith.constant 0.000000e+00 : f32
    %35 = vector.broadcast %cst_22 : f32 to vector<1x128xf32>
    %36 = arith.subf %35, %34 : vector<1x128xf32>
    %37 = math.exp %36 : vector<1x128xf32>
    %cst_23 = arith.constant 1.000000e+00 : f32
    %38 = vector.broadcast %cst_23 : f32 to vector<1x128xf32>
    %39 = arith.addf %38, %37 : vector<1x128xf32>
    %cst_24 = arith.constant 1.000000e+00 : f32
    %40 = vector.broadcast %cst_24 : f32 to vector<1x128xf32>
    %41 = arith.divf %40, %39 : vector<1x128xf32>
    %42 = arith.addf %19, %41 : vector<1x128xf32>
    %cst_25 = arith.constant 0.000000e+00 : f32
    %43 = vector.broadcast %cst_25 : f32 to vector<1x128xf32>
    %44 = arith.subf %43, %42 : vector<1x128xf32>
    %45 = math.exp %44 : vector<1x128xf32>
    %cst_26 = arith.constant 1.000000e+00 : f32
    %46 = vector.broadcast %cst_26 : f32 to vector<1x128xf32>
    %47 = arith.addf %46, %45 : vector<1x128xf32>
    %cst_27 = arith.constant 1.000000e+00 : f32
    %48 = vector.broadcast %cst_27 : f32 to vector<1x128xf32>
    %49 = arith.divf %48, %47 : vector<1x128xf32>
    %50 = vector.shape_cast %49 : vector<1x128xf32> to vector<1x128xf32>
    %51 = vector.broadcast %50 : vector<1x128xf32> to vector<8x128xf32>
    %c0_28 = arith.constant 0 : index
    %c0_29 = arith.constant 0 : index
    %52 = vector.load %arg8[%c0_28, %c0_29] : memref<8x128xf32, #tpu.memory_space<vmem>>, vector<8x128xf32>
    tpu.vector_store %arg8[%c0_28, %c0_29], %51 {strides = array<i32>} : memref<8x128xf32, #tpu.memory_space<vmem>>, vector<8x128xf32>,
    return
  }
  func.func @transform_0(%arg0: i32) -> (i32, i32) {
    %c0_i32 = arith.constant 0 : i32
    %c0_i32_0 = arith.constant 0 : i32
    return %c0_i32, %arg0 : i32, i32
  }
  func.func @transform_1(%arg0: i32) -> (i32, i32) {
    %c0_i32 = arith.constant 0 : i32
    %c0_i32_0 = arith.constant 0 : i32
    %c0_i32_1 = arith.constant 0 : i32
    return %c0_i32, %c0_i32_0 : i32, i32
  }
  func.func @transform_2(%arg0: i32) -> (i32, i32) {
    %c0_i32 = arith.constant 0 : i32
    %c0_i32_0 = arith.constant 0 : i32
    %c0_i32_1 = arith.constant 0 : i32
    return %c0_i32, %c0_i32_0 : i32, i32
  }
  func.func @transform_3(%arg0: i32) -> (i32, i32) {
    %c0_i32 = arith.constant 0 : i32
    %c0_i32_0 = arith.constant 0 : i32
    %c0_i32_1 = arith.constant 0 : i32
    return %c0_i32, %c0_i32_0 : i32, i32
  }
  func.func @transform_4(%arg0: i32) -> (i32, i32) {
    %c0_i32 = arith.constant 0 : i32
    %c0_i32_0 = arith.constant 0 : i32
    %c0_i32_1 = arith.constant 0 : i32
    return %c0_i32, %c0_i32_0 : i32, i32
  }
  func.func @transform_5(%arg0: i32) -> (i32, i32) {
    %c0_i32 = arith.constant 0 : i32
    %c0_i32_0 = arith.constant 0 : i32
    %c0_i32_1 = arith.constant 0 : i32
    return %c0_i32, %c0_i32_0 : i32, i32
  }
  func.func @transform_6(%arg0: i32) -> (i32, i32) {
    %c0_i32 = arith.constant 0 : i32
    %c0_i32_0 = arith.constant 0 : i32
    %c0_i32_1 = arith.constant 0 : i32
    return %c0_i32, %c0_i32_0 : i32, i32
  }
  func.func @transform_7(%arg0: i32) -> (i32, i32) {
    %c0_i32 = arith.constant 0 : i32
    %c0_i32_0 = arith.constant 0 : i32
    return %c0_i32, %arg0 : i32, i32
  }
}

</mosaic_0001>

<bundles_post_ra>
// kernel: forward.1
= control target key start
LH: loop header
LB: loop body
LE: loop exit
PB: predicated region body
PF: predicated region fallthrough
CT: control target
= control target key end

     0   :  { %s2230_s0 = inlined_call_operand.hbm [shape: f32[256,256], index: 0, kind: input, shape index: {}]   ;;  %s2231_s1 = inlined_call_operand.hbm [shape: f32[160,256], index: 1, kind: input, shape index: {}]   ;;  %s2232_s2 = inlined_call_operand.hbm [shape: f32[128,1], index: 2, kind: input, shape index: {}]   ;;  %s2233_s3 = inlined_call_operand.hbm [shape: f32[64,128], index: 3, kind: input, shape index: {}]   ;;  %s2234_s4 = inlined_call_operand.hbm [shape: f32[64,1], index: 4, kind: input, shape index: {}]   ;;  %s2235_s5 = inlined_call_operand.hbm [shape: f32[64,1], index: 5, kind: input, shape index: {}]   ;;  %s2236_s6 = inlined_call_operand.<no memory space> [shape: f32[1,1], index: 6, kind: input, shape index: {}]   ;;  %s2237_s7 = inlined_call_operand.hbm [shape: f32[8,256], index: 7, kind: output, shape index: {}]  }
   0x1   :  { %12 = sst [smem:[#allocation2]] %s2236_s6 }
   0x2   :  { %13 = vsyncpa [#allocation4], 0 }
   0x3   :  { %15 = vsyncpa [#allocation4 + $0x1], 0 }
   0x4   :  { %16 = vsyncpa [#allocation7], 0 }
   0x5   :  { %17 = vsyncpa [#allocation10], 0 }
   0x6   :  { %18 = vsyncpa [#allocation13], 0 }
   0x7   :  { %19 = vsyncpa [#allocation5], 0 }
   0x8   :  { %21 = vsyncpa [#allocation5 + $0x1], 0  ;;  %s1827_s26 = smov 0   ;;  %s1829_s27 = smov 0  }
   0x9   :  { %s1831_s28 = smov 0   ;;  %s1833_s29 = smov 0  }
   0xa LB: > { %s1848_s6 = sadd.s32 4294967295, %s1769_s29   ;;  %s1206_s30 = sadd.s32 4294967294, %s1769_s29   ;;  %s1769_s29 = sphi %s1833_s29, %s2267_s29   ;;  %s1765_s28 = sphi %s1831_s28, %s2266_s28   ;;  %s1761_s27 = sphi %s1829_s27, %s2265_s27   ;;  %s1757_s26 = sphi %s1827_s26, %s2264_s26  }
   0xb   : > { %p47_p0 = scmp.ne.s32.totalorder %s1761_s27, %s1757_s26  ;;  %p2238_p1 = scmp.eq.s32.totalorder %s1848_s6, 0 }
   0xc   : > { %p203_p3 = scmp.eq.s32.totalorder %s1206_s30, 1  ;;  %p1207_p5 = scmp.ge.s32.totalorder %s1769_s29, 1 }
   0xd   : > { %p1857_p4 = por %p2238_p1, %p47_p0  ;;  %p210_p7 = scmp.lt.s32.totalorder %s1769_s29, 3 }
   0xe   : > { %p1862_p6 = por %p203_p3, %p47_p0  ;;  %s1771_s11 = smov [#allocation6]  }
   0xf   : > { %s2243_s8 = scalar_select %p1857_p4, 1, 0 }
  0x10   : > { %s2244_s9 = scalar_select %p1862_p6, 1, 0 }
  0x11   : > { %p1867_p8 = pnand %p1207_p5, %p210_p7  ;;  %s222_s12 = sshll.u32 %s1771_s11, 4  ;;  %s223_s12 = int_to_ptr.vmem [resolvable:$true] %s222_s12 }
  0x12   : > { %2245 = sst [smem:[#allocation20_spill]] %s2244_s9  ;;  %s1772_s14 = smov [#allocation9]  }
  0x13   : > { %s2246_s10 = scalar_select %p1867_p8, 1, 0 }
  0x14   : > { %p1432_p9 = pneg %p1867_p8  ;;  %s248_s15 = sshll.u32 %s1772_s14, 4  ;;  %s249_s15 = int_to_ptr.vmem [resolvable:$true] %s248_s15 }
  0x15   : > { %s1521_s18 = scalar_lea.hbm %s2231_s1, 5120 }
  0x16   : > { %p1876_p11 = pnand %p1432_p9, %p2238_p1  ;;  %p1522_p12 = scmp.ne.s32.totalorder %s2231_s1, %s1521_s18 }
  0x17   : > { %p1528_p5 = scmp.lt.u32.totalorder %s1521_s18, %s2231_s1 }
  0x18   : > { %p1888_p13 = pneg %p1876_p11 }
  0x1a   : > { %p1524_p0 = pnand %p1888_p13, %p1522_p12 }
  0x1c   : > { %p1525_p3 = pneg %p1524_p0 }
  0x1e   : > { %p1530_p7 = pnand %p1528_p5, %p1525_p3 }
  0x20   : > { %1533 = shalt.err (!%p1530_p7)
}
  0x21   : > { %s1534_s24 = scalar_lea.vmem %s223_s12, 5120  ;;  %p1542_p2 = scmp.lt.s32.totalorder %s223_s12, %s223_s12 }
  0x22   : > { %p1535_p9 = scmp.ne.s32.totalorder %s223_s12, %s1534_s24  ;;  %p1543_p6 = scmp.lt.s32.totalorder %s1534_s24, %s1534_s24 }
  0x24   : > { %p1537_p10 = pnand %p1535_p9, %p1888_p13  ;;  %p1544_p4 = por %p1543_p6, %p1542_p2 }
  0x26   : > { %p1538_p1 = pneg %p1537_p10 }
  0x28   : > { %p1545_p8 = pnand %p1544_p4, %p1538_p1 }
  0x2a   : > { %1548 = shalt.err (!%p1545_p8)
}
  0x2b   : > { %s2242_s25 = smov 256   ;;  %s1774_s30 = smov 16  }
  0x2c   : > { %1435 = dma.hbm_to_vmem [thread:$0]  (!%p1876_p11), %s2231_s1, 5120, %s223_s12, [#allocation7], %s2242_s25, %s2242_s25, %s1774_s30  }
  0x2d   : > { %s1775_s16 = smov [#allocation8]   ;;  %s1549_s20 = scalar_lea.hbm %s2233_s3, 1024 }
  0x2e   : > { %s235_s17 = sshll.u32 %s1775_s16, 4  ;;  %p1550_p1 = scmp.ne.s32.totalorder %s2233_s3, %s1549_s20  ;;  %s236_s17 = int_to_ptr.vmem [resolvable:$true] %s235_s17 }
  0x2f   : > { %p1556_p6 = scmp.lt.u32.totalorder %s1549_s20, %s2233_s3 }
  0x30   : > { %p1552_p2 = pnand %p1550_p1, %p1888_p13 }
  0x32   : > { %p1553_p4 = pneg %p1552_p2 }
  0x34   : > { %p1558_p8 = pnand %p1556_p6, %p1553_p4 }
  0x36   : > { %1561 = shalt.err (!%p1558_p8)
}
  0x37   : > { %s1562_s12 = scalar_lea.vmem %s249_s15, 1024  ;;  %p1570_p3 = scmp.lt.s32.totalorder %s249_s15, %s249_s15 }
  0x38   : > { %p1563_p10 = scmp.ne.s32.totalorder %s249_s15, %s1562_s12  ;;  %p1571_p5 = scmp.lt.s32.totalorder %s1562_s12, %s1562_s12 }
  0x3a   : > { %p1565_p12 = pnand %p1563_p10, %p1888_p13  ;;  %p1572_p7 = por %p1571_p5, %p1570_p3 }
  0x3c   : > { %p1566_p0 = pneg %p1565_p12 }
  0x3e   : > { %p1573_p9 = pnand %p1572_p7, %p1566_p0 }
  0x40   : > { %1576 = shalt.err (!%p1573_p9)
}
  0x41   : > { %s1776_s30 = smov 128   ;;  %s1777_s11 = smov 8  }
  0x42   : > { %1441 = dma.hbm_to_vmem [thread:$0]  (!%p1876_p11), %s2233_s3, 1024, %s249_s15, [#allocation10], %s1776_s30, %s1776_s30, %s1777_s11  }
  0x43   : > { %s1577_s19 = scalar_lea.hbm %s2232_s2, 2048 }
  0x44   : > { %p1578_p1 = scmp.ne.s32.totalorder %s2232_s2, %s1577_s19  ;;  %p1584_p6 = scmp.lt.u32.totalorder %s1577_s19, %s2232_s2 }
  0x46   : > { %p1580_p2 = pnand %p1578_p1, %p1888_p13 }
  0x48   : > { %p1581_p4 = pneg %p1580_p2 }
  0x4a   : > { %p1586_p8 = pnand %p1584_p6, %p1581_p4 }
  0x4c   : > { %1589 = shalt.err (!%p1586_p8)
}
  0x4d   : > { %s1590_s12 = scalar_lea.vmem %s236_s17, 2048  ;;  %p1598_p3 = scmp.lt.s32.totalorder %s236_s17, %s236_s17 }
  0x4e   : > { %p1591_p10 = scmp.ne.s32.totalorder %s236_s17, %s1590_s12  ;;  %p1599_p5 = scmp.lt.s32.totalorder %s1590_s12, %s1590_s12 }
  0x50   : > { %p1593_p12 = pnand %p1591_p10, %p1888_p13  ;;  %p1600_p7 = por %p1599_p5, %p1598_p3 }
  0x52   : > { %p1594_p0 = pneg %p1593_p12 }
  0x54   : > { %p1601_p9 = pnand %p1600_p7, %p1594_p0 }
  0x56   : > { %1604 = shalt.err (!%p1601_p9)
}
  0x57   : > { %1438 = dma.hbm_to_vmem [thread:$0]  (!%p1876_p11), %s2232_s2, 2048, %s236_s17, [#allocation7], %s1776_s30, %s1776_s30, %s1777_s11  }
  0x58   : > { %s1778_s14 = smov [#allocation11]   ;;  %s1779_s18 = smov [#allocation12]  }
  0x59   : > { %s261_s16 = sshll.u32 %s1778_s14, 4  ;;  %s274_s19 = sshll.u32 %s1779_s18, 4  ;;  %s262_s16 = int_to_ptr.vmem [resolvable:$true] %s261_s16  ;;  %s275_s19 = int_to_ptr.vmem [resolvable:$true] %s274_s19 }
  0x5a   : > { %s1605_s23 = scalar_lea.hbm %s2234_s4, 1024 }
  0x5b   : > { %p1606_p1 = scmp.ne.s32.totalorder %s2234_s4, %s1605_s23  ;;  %p1612_p6 = scmp.lt.u32.totalorder %s1605_s23, %s2234_s4 }
  0x5d   : > { %p1608_p2 = pnand %p1606_p1, %p1888_p13 }
  0x5f   : > { %p1609_p4 = pneg %p1608_p2 }
  0x61   : > { %p1614_p8 = pnand %p1612_p6, %p1609_p4 }
  0x63   : > { %1617 = shalt.err (!%p1614_p8)
}
  0x64   : > { %s1618_s17 = scalar_lea.vmem %s262_s16, 1024  ;;  %p1626_p3 = scmp.lt.s32.totalorder %s262_s16, %s262_s16 }
  0x65   : > { %p1619_p10 = scmp.ne.s32.totalorder %s262_s16, %s1618_s17  ;;  %p1627_p5 = scmp.lt.s32.totalorder %s1618_s17, %s1618_s17 }
  0x67   : > { %p1621_p12 = pnand %p1619_p10, %p1888_p13  ;;  %p1628_p7 = por %p1627_p5, %p1626_p3 }
  0x69   : > { %p1622_p0 = pneg %p1621_p12 }
  0x6b   : > { %p1629_p9 = pnand %p1628_p7, %p1622_p0 }
  0x6d   : > { %1632 = shalt.err (!%p1629_p9)
}
  0x6e   : > { %1444 = dma.hbm_to_vmem [thread:$0]  (!%p1876_p11), %s2234_s4, 1024, %s262_s16, [#allocation10], %s1776_s30, %s1776_s30, %s1777_s11  }
  0x6f   : > { %s1633_s20 = scalar_lea.hbm %s2235_s5, 1024 }
  0x70   : > { %p1634_p1 = scmp.ne.s32.totalorder %s2235_s5, %s1633_s20  ;;  %p1640_p6 = scmp.lt.u32.totalorder %s1633_s20, %s2235_s5 }
  0x72   : > { %p1636_p2 = pnand %p1634_p1, %p1888_p13 }
  0x74   : > { %p1637_p4 = pneg %p1636_p2 }
  0x76   : > { %p1642_p8 = pnand %p1640_p6, %p1637_p4 }
  0x78   : > { %1645 = shalt.err (!%p1642_p8)
}
  0x79   : > { %s1646_s15 = scalar_lea.vmem %s275_s19, 1024  ;;  %p1654_p3 = scmp.lt.s32.totalorder %s275_s19, %s275_s19 }
  0x7a   : > { %p1647_p10 = scmp.ne.s32.totalorder %s275_s19, %s1646_s15  ;;  %p1655_p5 = scmp.lt.s32.totalorder %s1646_s15, %s1646_s15 }
  0x7c   : > { %p1649_p12 = pnand %p1647_p10, %p1888_p13  ;;  %p1656_p7 = por %p1655_p5, %p1654_p3 }
  0x7e   : > { %p1650_p0 = pneg %p1649_p12 }
  0x80   : > { %p1657_p9 = pnand %p1656_p7, %p1650_p0 }
  0x82   : > { %1660 = shalt.err (!%p1657_p9)
}
  0x83   : > { %1447 = dma.hbm_to_vmem [thread:$0]  (!%p1876_p11), %s2235_s5, 1024, %s275_s19, [#allocation13], %s1776_s30, %s1776_s30, %s1777_s11  }
  0x84   : > { %s1991_s21 = sadd.s32 1, %s1769_s29   ;;  %s34_s25 = sadd.s32 1, %s1765_s28 }
  0x85   : > { %s31_s13 = ssub.s32 %s1769_s29, %s1991_s21  ;;  %p41_p1 = scmp.ne.s32.totalorder %s1765_s28, %s1761_s27 }
  0x86   : > { %p32_p13 = scmp.eq.s32.totalorder %s31_s13, 0  ;;  %p42_p2 = scmp.eq.s32.totalorder %s1769_s29, 0 }
  0x87   : > { %p1461_p4 = scmp.lt.s32.totalorder %s1769_s29, 2  ;;  %p2249_p8 = scmp.eq.s32.totalorder %s1848_s6, 1 }
  0x88   : > { %s2001_s9 = scalar_select %p32_p13, %s1765_s28, %s34_s25  }
  0x89   : > { %p43_p6 = por %p42_p2, %p41_p1  ;;  %p2005_p10 = por %p2249_p8, %p41_p1 }
  0x8a   : > { %s291_s18 = sand.u32 1, %s1765_s28   ;;  %s1215_s20 = sshll.u32 %s1769_s29, 7 }
  0x8b   : > { %s1214_s19 = sshll.u32 %s291_s18, 8  ;;  %s2014_s24 = scalar_lea.hbm %s2230_s0, %s1215_s20 }
  0x8c   : > { %s295_s12 = scalar_lea.vmem [#allocation3], %s1214_s19  ;;  %p2016_p11 = pnand %p1461_p4, %p43_p6 }
  0x8d   : > { %s301_s15 = sshll.u32 %s295_s12, 4  ;;  %s2022_s17 = scalar_lea.sflag [#allocation4], %s291_s18  ;;  %s2020_s15 = int_to_ptr.vmem [resolvable:$true] %s301_s15 }
  0x8e   : > { %s1661_s13 = scalar_lea.hbm %s2014_s24, 4096  ;;  %p1663_p0 = pneg %p2016_p11 }
  0x8f   : > { %p1662_p12 = scmp.ne.s32.totalorder %s2014_s24, %s1661_s13  ;;  %s1666_s19 = scalar_lea.hbm %s2230_s0, 8192 }
  0x90   : > { %p1667_p7 = scmp.lt.u32.totalorder %s2014_s24, %s2230_s0  ;;  %p1668_p9 = scmp.lt.u32.totalorder %s1666_s19, %s1661_s13 }
  0x91   : > { %p1664_p3 = pnand %p1663_p0, %p1662_p12  ;;  %p1670_p1 = scmp.lt.u32.totalorder %s1661_s13, %s2014_s24 }
  0x92   : > { %p1669_p13 = por %p1668_p9, %p1667_p7 }
  0x93   : > { %p1665_p5 = pneg %p1664_p3 }
  0x94   : > { %p1671_p2 = por %p1670_p1, %p1669_p13 }
  0x96   : > { %p1672_p4 = pnand %p1671_p2, %p1665_p5 }
  0x98   : > { %1675 = shalt.err (!%p1672_p4)
}
  0x99   : > { %s1676_s18 = scalar_lea.vmem %s2020_s15, 4096  ;;  %s1780_s12 = smov [#allocation3]  }
  0x9a   : > { %p1677_p6 = scmp.ne.s32.totalorder %s2020_s15, %s1676_s18  ;;  %s1681_s25 = sshll.u32 %s1780_s12, 4  ;;  %s1682_s25 = int_to_ptr.vmem [resolvable:$false] %s1681_s25 }
  0x9b   : > { %s1683_s20 = scalar_lea.vmem %s1682_s25, 8192  ;;  %p1684_p3 = scmp.lt.s32.totalorder %s2020_s15, %s1682_s25 }
  0x9c   : > { %p1679_p8 = pnand %p1677_p6, %p1663_p0  ;;  %p1685_p7 = scmp.lt.s32.totalorder %s1683_s20, %s1676_s18 }
  0x9e   : > { %p1680_p12 = pneg %p1679_p8  ;;  %p1686_p9 = por %p1685_p7, %p1684_p3 }
  0xa0   : > { %p1687_p13 = pnand %p1686_p9, %p1680_p12 }
  0xa2   : > { %1690 = shalt.err (!%p1687_p13)
}
  0xa3   : > { %s2252_s13 = smov 256   ;;  %p2253_p0 = scmp.ne.s32.totalorder %s2246_s10, 0 }
  0xa4   : > { %1451 = dma.hbm_to_vmem [thread:$0]  (!%p2016_p11), %s2014_s24, 4096, %s2020_s15, %s2022_s17, %s2252_s13, %s1776_s30, %s1777_s11  }
  0xa5   : > { %313 = sbr.rel (%p2253_p0) target bundleno = 852 (0x354), region = 48  ;;  %s2056_s19 = sand.u32 (!%p2253_p0), 1, %s1761_s27  }
  0xa6   : > { %s1217_s22 = sshll.u32 (!%p2253_p0), %s2056_s19, 8  ;;  %s316_s23 = scalar_lea.sflag (!%p2253_p0), [#allocation4], %s2056_s19 }
  0xa7   : > { %s2060_s18 = scalar_lea.vmem (!%p2253_p0), [#allocation3], %s1217_s22  ;;  %p2254_p5 = scmp.ne.s32.totalorder (!%p2253_p0), %s2243_s8, 0 }
  0xac   : > { %1736 = dma.done.wait (%p2254_p5), %s316_s23, 4096  }
  0xad   : > { %1738 = vsyncadd (%p2254_p5), %s316_s23, 4294963200  ;;  %p2255_p11 = scmp.eq.s32.totalorder %s1848_s6, 0 }
  0xaf   : > { %1740 = dma.done.wait (%p2255_p11), [#allocation7], 7168   ;;  %p2256_p1 = pmov %p2255_p11 }
  0xb1   : > { %1742 = vsyncadd (%p2256_p1), [#allocation7], 4294960128  ;;  %p2257_p2 = pmov %p2256_p1 }
  0xb2   : > { %p2258_p4 = pmov %p2256_p1 }
  0xb3   : > { %1744 = dma.done.wait (%p2257_p2), [#allocation10], 2048  }
  0xb4   : > { %1746 = vsyncadd (%p2258_p4), [#allocation10], 4294965248  ;;  %p2259_p6 = pmov %p2256_p1 }
  0xb5   : > { %p2260_p8 = pmov %p2256_p1 }
  0xb6   : > { %1748 = dma.done.wait (%p2259_p6), [#allocation13], 1024  }
  0xb7   : > { %1750 = vsyncadd (%p2260_p8), [#allocation13], 4294966272  ;;  %v1781_v0 = vmov 0.0|0.0   ;;  %v1782_v1 = vmov 0   ;;  %v410_v2 = vld [vmem:[%s2060_s18] sm:$0xff]  ;;  %v411_v3 = vld [vmem:[%s2060_s18 + $0x8] sm:$0xff] }
  0xb8   : > { %1296 = vmatprep.subr.bf16.mxu0 %v1781_v0  ;;  %1376 = vmatprep.subr.bf16.mxu1 %v1781_v0  ;;  %v412_v4 = vld [vmem:[%s2060_s18 + $0x10] sm:$0xff]  ;;  %v1297_v5 = vpack.c.bf16 %v411_v3, %v410_v2  ;;  %v748_v6 = vmul.f32 %v410_v2, %v410_v2  ;;  %v749_v7 = vmul.f32 %v411_v3, %v411_v3  ;;  %v413_v8 = vld [vmem:[%s2060_s18 + $0x18] sm:$0xff]  ;;  %v414_v13 = vld [vmem:[%s2060_s18 + $0x20] sm:$0xff]  ;;  %s1057_s8 = sld [smem:[#allocation2]]  ;;  %s1223_s10 = sshll.u32 %s2056_s19, 3 }
  0xb9   : > { %1511 = vset.pattern.permute.xlu0 %v1782_v1  ;;  %1512 = vset.pattern.permute.xlu1 %v1782_v1  ;;  %v750_v9 = vmul.f32 %v412_v4, %v412_v4  ;;  %v1300_v11 = vpack.c.bf16 %v413_v8, %v412_v4  ;;  %v751_v12 = vmul.f32 %v413_v8, %v413_v8  ;;  %v415_v14 = vld [vmem:[%s2060_s18 + $0x28] sm:$0xff]  ;;  %v416_v20 = vld [vmem:[%s2060_s18 + $0x30] sm:$0xff]  ;;  %v417_v21 = vld [vmem:[%s2060_s18 + $0x38] sm:$0xff]  ;;  %s1225_s30 = sshll.u32 %s1848_s6, 7  ;;  %s369_s11 = scalar_lea.vmem [#allocation14], %s1223_s10 }
  0xba   : > { %1298 = vmatpush1.bf16.msra.mxu0 %v1297_v5  ;;  %v780_v10 = vadd.f32 %v749_v7, %v748_v6  ;;  %1392 = vmatpush1.bf16.msra.mxu1 %v1297_v5  ;;  %v752_v16 = vmul.f32 %v414_v13, %v414_v13  ;;  %v1303_v18 = vpack.c.bf16 %v415_v14, %v414_v13  ;;  %v371_v24 = vld [vmem:[#allocation6 + $0x8] sm:$0xff]  ;;  %v418_v29 = vld [vmem:[%s2060_s18 + $0x40] sm:$0xff]  ;;  %v420_v36 = vld [vmem:[%s2060_s18 + $0x50] sm:$0xff]  ;;  %s1088_s24 = sshll.u32 %s369_s11, 4  ;;  %s2186_s17 = scalar_lea.hbm %s2237_s7, %s1225_s30  ;;  %s2188_s24 = int_to_ptr.vmem [resolvable:$true] %s1088_s24 }
  0xbb   : > { %1299 = vmatprep.subr.bf16.mxu0 %v1781_v0  ;;  %1377 = vmatprep.subr.bf16.mxu1 %v1781_v0  ;;  %v753_v19 = vmul.f32 %v415_v14, %v415_v14  ;;  %v754_v23 = vmul.f32 %v416_v20, %v416_v20  ;;  %v1306_v26 = vpack.c.bf16 %v417_v21, %v416_v20  ;;  %v395_v28 = vld [vmem:[#allocation6 + $0xc8] sm:$0xff]  ;;  %v421_v37 = vld [vmem:[%s2060_s18 + $0x58] sm:$0xff]  ;;  %v422_v43 = vld [vmem:[%s2060_s18 + $0x60] sm:$0xff]  ;;  %s1075_s12 = scalar_lea.sflag [#allocation5], %s2056_s19  ;;  %s1691_s25 = scalar_lea.vmem %s2188_s24, 128 }
  0xbc   : > { %v781_v15 = vadd.f32 %v780_v10, %v750_v9  ;;  %v755_v27 = vmul.f32 %v417_v21, %v417_v21  ;;  %v419_v30 = vld [vmem:[%s2060_s18 + $0x48] sm:$0xff]  ;;  %v756_v32 = vmul.f32 %v418_v29, %v418_v29  ;;  %506 = vmatprep.mubr.f32.mxu0 %v371_v24  ;;  %566 = vmatprep.mubr.f32.mxu1 %v395_v28  ;;  %v424_v50 = vld [vmem:[%s2060_s18 + $0x70] sm:$0xff]  ;;  %v425_v51 = vld [vmem:[%s2060_s18 + $0x78] sm:$0xff]  ;;  %p1692_p12 = scmp.ne.s32.totalorder %s2188_s24, %s1691_s25  ;;  %s1783_s6 = smov [#allocation14]  }
  0xbd   : > { %v1309_v34 = vpack.c.bf16 %v419_v30, %v418_v29  ;;  %v757_v35 = vmul.f32 %v419_v30, %v419_v30  ;;  %v758_v39 = vmul.f32 %v420_v36, %v420_v36  ;;  %v1312_v41 = vpack.c.bf16 %v421_v37, %v420_v36  ;;  %v423_v44 = vld [vmem:[%s2060_s18 + $0x68] sm:$0xff]  ;;  %v607_v52 = vld [vmem:[#allocation8] sm:$0xff]  ;;  %v609_v53 = vld [vmem:[#allocation8 + $0x10] sm:$0xff]  ;;  %s1695_s20 = sshll.u32 %s1783_s6, 4  ;;  %s1696_s20 = int_to_ptr.vmem [resolvable:$false] %s1695_s20 }
  0xbe   : > { %1301 = vmatpush1.bf16.msra.mxu0 %v1300_v11  ;;  %v782_v17 = vadd.f32 %v781_v15, %v751_v12  ;;  %1393 = vmatpush1.bf16.msra.mxu1 %v1300_v11  ;;  %v759_v42 = vmul.f32 %v421_v37, %v421_v37  ;;  %v760_v46 = vmul.f32 %v422_v43, %v422_v43  ;;  %v608_v56 = vld [vmem:[#allocation8 + $0x8] sm:$0xff]  ;;  %v610_v57 = vld [vmem:[#allocation8 + $0x18] sm:$0xff]  ;;  %v426_v61 = vld [vmem:[%s2060_s18 + $0x80] sm:$0xff]  ;;  %p1693_p3 = pnand %p1692_p12, %p2005_p10  ;;  %s1697_s13 = scalar_lea.vmem %s1696_s20, 256 }
  0xbf   : > { %1302 = vmatprep.subr.bf16.mxu0 %v1781_v0  ;;  %1378 = vmatprep.subr.bf16.mxu1 %v1781_v0  ;;  %v1315_v48 = vpack.c.bf16 %v423_v44, %v422_v43  ;;  %v761_v49 = vmul.f32 %v423_v44, %v423_v44  ;;  %v762_v55 = vmul.f32 %v424_v50, %v424_v50  ;;  %v427_v62 = vld [vmem:[%s2060_s18 + $0x88] sm:$0xff]  ;;  %v611_v2 = vld [vmem:[#allocation8 + $0x20] sm:$0xff]  ;;  %v428_v7 = vld [vmem:[%s2060_s18 + $0x90] sm:$0xff]  ;;  %p1698_p9 = scmp.lt.s32.totalorder %s2188_s24, %s1696_s20  ;;  %p1699_p13 = scmp.lt.s32.totalorder %s1697_s13, %s1691_s25 }
  0xc0   : > { %v783_v22 = vadd.f32 %v782_v17, %v752_v16  ;;  %625 = vperm.xlu0 %1511, %v607_v52   ;;  %635 = vperm.xlu1 %1512, %v609_v53   ;;  %v1318_v59 = vpack.c.bf16 %v425_v51, %v424_v50  ;;  %v763_v60 = vmul.f32 %v425_v51, %v425_v51  ;;  %v612_v3 = vld [vmem:[#allocation8 + $0x28] sm:$0xff]  ;;  %v429_v8 = vld [vmem:[%s2060_s18 + $0x98] sm:$0xff]  ;;  %v613_v11 = vld [vmem:[#allocation8 + $0x30] sm:$0xff]  ;;  %p1694_p7 = pneg %p1693_p3 }
  0xc1   : > { %v764_v1 = vmul.f32 %v426_v61, %v426_v61  ;;  %v1321_v5 = vpack.c.bf16 %v427_v62, %v426_v61  ;;  %v765_v6 = vmul.f32 %v427_v62, %v427_v62  ;;  %v766_v10 = vmul.f32 %v428_v7, %v428_v7  ;;  %v614_v12 = vld [vmem:[#allocation8 + $0x38] sm:$0xff]  ;;  %v430_v16 = vld [vmem:[%s2060_s18 + $0xa0] sm:$0xff]  ;;  %v431_v17 = vld [vmem:[%s2060_s18 + $0xa8] sm:$0xff]  ;;  %p1700_p0 = por %p1699_p13, %p1698_p9 }
  0xc2   : > { %1304 = vmatpush1.bf16.msra.mxu0 %v1303_v18  ;;  %v784_v25 = vadd.f32 %v783_v22, %v753_v19  ;;  %1394 = vmatpush1.bf16.msra.mxu1 %v1303_v18  ;;  %v1324_v14 = vpack.c.bf16 %v429_v8, %v428_v7  ;;  %v767_v15 = vmul.f32 %v429_v8, %v429_v8  ;;  %v615_v20 = vld [vmem:[#allocation8 + $0x40] sm:$0xff]  ;;  %v616_v21 = vld [vmem:[#allocation8 + $0x48] sm:$0xff]  ;;  %v617_v29 = vld [vmem:[#allocation8 + $0x50] sm:$0xff] }
  0xc3   : > { %1305 = vmatprep.subr.bf16.mxu0 %v1781_v0  ;;  %1379 = vmatprep.subr.bf16.mxu1 %v1781_v0  ;;  %v768_v19 = vmul.f32 %v430_v16, %v430_v16  ;;  %v769_v24 = vmul.f32 %v431_v17, %v431_v17  ;;  %v618_v30 = vld [vmem:[#allocation8 + $0x58] sm:$0xff]  ;;  %v436_v43 = vld [vmem:[%s2060_s18 + $0xd0] sm:$0xff]  ;;  %v438_v52 = vld [vmem:[%s2060_s18 + $0xe0] sm:$0xff]  ;;  %p1701_p5 = pnand %p1700_p0, %p1694_p7 }
  0xc4   : > { %v785_v31 = vadd.f32 %v784_v25, %v754_v23  ;;  %630 = vperm.xlu0 %1511, %v608_v56   ;;  %640 = vperm.xlu1 %1512, %v610_v57   ;;  %v1327_v23 = vpack.c.bf16 %v431_v17, %v430_v16  ;;  %v432_v25 = vld [vmem:[%s2060_s18 + $0xb0] sm:$0xff]  ;;  %v437_v44 = vld [vmem:[%s2060_s18 + $0xd8] sm:$0xff]  ;;  %v439_v53 = vld [vmem:[%s2060_s18 + $0xe8] sm:$0xff] }
  0xc5   : > { %v770_v28 = vmul.f32 %v432_v25, %v432_v25  ;;  %v1336_v50 = vpack.c.bf16 %v437_v44, %v436_v43  ;;  %v775_v51 = vmul.f32 %v437_v44, %v437_v44  ;;  %v827_v56 = vld [vmem:[#allocation11] sm:$0xff]  ;;  %v828_v57 = vld [vmem:[#allocation11 + $0x8] sm:$0xff]  ;;  %v440_v61 = vld [vmem:[%s2060_s18 + $0xf0] sm:$0xff] }
  0xc6   : > { %1307 = vmatpush1.bf16.msra.mxu0 %v1306_v26  ;;  %v786_v33 = vadd.f32 %v785_v31, %v755_v27  ;;  %1395 = vmatpush1.bf16.msra.mxu1 %v1306_v26  ;;  %v433_v26 = vld [vmem:[%s2060_s18 + $0xb8] sm:$0xff]  ;;  %v988_v8 = vld [vmem:[#allocation12] sm:$0xff]  ;;  %v990_v16 = vld [vmem:[#allocation12 + $0x10] sm:$0xff] }
  0xc7   : > { %1308 = vmatprep.subr.bf16.mxu0 %v1781_v0  ;;  %1380 = vmatprep.subr.bf16.mxu1 %v1781_v0  ;;  %v441_v62 = vld [vmem:[%s2060_s18 + $0xf8] sm:$0xff]  ;;  %v396_v17 = vld [vmem:[#allocation6 + $0xd0] sm:$0xff]  ;;  %v382_v44 = vld [vmem:[#allocation6 + $0x60] sm:$0xff] }
  0xc8   : > { %v787_v38 = vadd.f32 %v786_v33, %v756_v32  ;;  %645 = vperm.xlu0 %1511, %v611_v2   ;;  %650 = vperm.xlu1 %1512, %v612_v3   ;;  %v1330_v32 = vpack.c.bf16 %v433_v26, %v432_v25  ;;  %v771_v33 = vmul.f32 %v433_v26, %v433_v26  ;;  %v829_v2 = vld [vmem:[#allocation11 + $0x10] sm:$0xff]  ;;  %v830_v3 = vld [vmem:[#allocation11 + $0x18] sm:$0xff] }
  0xc9   : > { %v401_v25 = vld [vmem:[#allocation6 + $0xf8] sm:$0xff]  ;;  %v833_v26 = vld [vmem:[#allocation11 + $0x30] sm:$0xff] }
  0xca   : > { %1310 = vmatpush1.bf16.msra.mxu0 %v1309_v34  ;;  %v788_v40 = vadd.f32 %v787_v38, %v757_v35  ;;  %1396 = vmatpush1.bf16.msra.mxu1 %v1309_v34  ;;  %v434_v34 = vld [vmem:[%s2060_s18 + $0xc0] sm:$0xff]  ;;  %v435_v35 = vld [vmem:[%s2060_s18 + $0xc8] sm:$0xff] }
  0xcb   : > { %1311 = vmatprep.subr.bf16.mxu0 %v1781_v0  ;;  %1381 = vmatprep.subr.bf16.mxu1 %v1781_v0  ;;  %v772_v37 = vmul.f32 %v434_v34, %v434_v34  ;;  %v619_v38 = vld [vmem:[#allocation8 + $0x60] sm:$0xff] }
  0xcc   : > { %v789_v45 = vadd.f32 %v788_v40, %v758_v39  ;;  %655 = vperm.xlu0 %1511, %v613_v11   ;;  %660 = vperm.xlu1 %1512, %v614_v12   ;;  %v620_v39 = vld [vmem:[#allocation8 + $0x68] sm:$0xff]  ;;  %v370_v11 = vld [vmem:[#allocation6] sm:$0xff] }
  0xcd   : > { %v394_v12 = vld [vmem:[#allocation6 + $0xc0] sm:$0xff] }
  0xce   : > { %1313 = vmatpush1.bf16.msra.mxu0 %v1312_v41  ;;  %v790_v47 = vadd.f32 %v789_v45, %v759_v42  ;;  %1397 = vmatpush1.bf16.msra.mxu1 %v1312_v41  ;;  %v1333_v41 = vpack.c.bf16 %v435_v35, %v434_v34  ;;  %v773_v42 = vmul.f32 %v435_v35, %v435_v35  ;;  %v378_v34 = vld [vmem:[#allocation6 + $0x40] sm:$0xff] }
  0xcf   : > { %1314 = vmatprep.subr.bf16.mxu0 %v1781_v0  ;;  %1382 = vmatprep.subr.bf16.mxu1 %v1781_v0  ;;  %v402_v35 = vld [vmem:[#allocation6 + $0x100] sm:$0xff] }
  0xd0   : > { %v791_v54 = vadd.f32 %v790_v47, %v760_v46  ;;  %665 = vperm.xlu0 %1511, %v615_v20   ;;  %670 = vperm.xlu1 %1512, %v616_v21   ;;  %v774_v46 = vmul.f32 %v436_v43, %v436_v43  ;;  %v621_v47 = vld [vmem:[#allocation8 + $0x70] sm:$0xff]  ;;  %v832_v20 = vld [vmem:[#allocation11 + $0x28] sm:$0xff]  ;;  %v991_v21 = vld [vmem:[#allocation12 + $0x18] sm:$0xff] }
  0xd1   : > { %v407_v43 = vld [vmem:[#allocation6 + $0x128] sm:$0xff] }
  0xd2   : > { %1316 = vmatpush1.bf16.msra.mxu0 %v1315_v48  ;;  %v792_v58 = vadd.f32 %v791_v54, %v761_v49  ;;  %1398 = vmatpush1.bf16.msra.mxu1 %v1315_v48  ;;  %v622_v48 = vld [vmem:[#allocation8 + $0x78] sm:$0xff] }
  0xd3   : > { %1317 = vmatprep.subr.bf16.mxu0 %v1781_v0  ;;  %1383 = vmatprep.subr.bf16.mxu1 %v1781_v0 }
  0xd4   : > { %v793_v63 = vadd.f32 %v792_v58, %v762_v55  ;;  %675 = vperm.xlu0 %1511, %v617_v29   ;;  %680 = vperm.xlu1 %1512, %v618_v30   ;;  %v776_v55 = vmul.f32 %v438_v52, %v438_v52  ;;  %v400_v29 = vld [vmem:[#allocation6 + $0xf0] sm:$0xff]  ;;  %v379_v30 = vld [vmem:[#allocation6 + $0x48] sm:$0xff] }
  0xd6   : > { %1319 = vmatpush1.bf16.msra.mxu0 %v1318_v59  ;;  %v794_v4 = vadd.f32 %v793_v63, %v763_v60  ;;  %1399 = vmatpush1.bf16.msra.mxu1 %v1318_v59  ;;  %v1339_v59 = vpack.c.bf16 %v439_v53, %v438_v52  ;;  %v777_v60 = vmul.f32 %v439_v53, %v439_v53  ;;  %v389_v52 = vld [vmem:[#allocation6 + $0x98] sm:$0xff]  ;;  %v388_v53 = vld [vmem:[#allocation6 + $0x90] sm:$0xff] }
  0xd7   : > { %1320 = vmatprep.subr.bf16.mxu0 %v1781_v0  ;;  %1384 = vmatprep.subr.bf16.mxu1 %v1781_v0 }
  0xd8   : > { %v795_v9 = vadd.f32 %v794_v4, %v764_v1  ;;  %685 = vperm.xlu0 %1511, %v619_v38   ;;  %690 = vperm.xlu1 %1512, %v620_v39   ;;  %v778_v1 = vmul.f32 %v440_v61, %v440_v61  ;;  %v994_v38 = vld [vmem:[#allocation12 + $0x30] sm:$0xff]  ;;  %v995_v39 = vld [vmem:[#allocation12 + $0x38] sm:$0xff] }
  0xda   : > { %1322 = vmatpush1.bf16.msra.mxu0 %v1321_v5  ;;  %v796_v13 = vadd.f32 %v795_v9, %v765_v6  ;;  %1400 = vmatpush1.bf16.msra.mxu1 %v1321_v5  ;;  %v1342_v5 = vpack.c.bf16 %v441_v62, %v440_v61  ;;  %v779_v6 = vmul.f32 %v441_v62, %v441_v62  ;;  %v989_v9 = vld [vmem:[#allocation12 + $0x8] sm:$0xff] }
  0xdb   : > { %1323 = vmatprep.subr.bf16.mxu0 %v1781_v0  ;;  %1385 = vmatprep.subr.bf16.mxu1 %v1781_v0 }
  0xdc   : > { %v797_v18 = vadd.f32 %v796_v13, %v766_v10  ;;  %695 = vperm.xlu0 %1511, %v621_v47   ;;  %700 = vperm.xlu1 %1512, %v622_v48   ;;  %v373_v13 = vld [vmem:[#allocation6 + $0x18] sm:$0xff]  ;;  %v384_v48 = vld [vmem:[#allocation6 + $0x70] sm:$0xff] }
  0xdd   : > { %v409_v47 = vld [vmem:[#allocation6 + $0x138] sm:$0xff] }
  0xde   : > { %1325 = vmatpush1.bf16.msra.mxu0 %v1324_v14  ;;  %v798_v22 = vadd.f32 %v797_v18, %v767_v15  ;;  %1401 = vmatpush1.bf16.msra.mxu1 %v1324_v14  ;;  %v397_v14 = vld [vmem:[#allocation6 + $0xd8] sm:$0xff]  ;;  %v831_v15 = vld [vmem:[#allocation11 + $0x20] sm:$0xff]  ;;  %v375_v18 = vld [vmem:[#allocation6 + $0x28] sm:$0xff] }
  0xdf   : > { %1326 = vmatprep.subr.bf16.mxu0 %v1781_v0  ;;  %1386 = vmatprep.subr.bf16.mxu1 %v1781_v0 }
  0xe0   : > { %v799_v27 = vadd.f32 %v798_v22, %v768_v19  ;;  %837 = vperm.xlu0 %1511, %v827_v56   ;;  %842 = vperm.xlu1 %1512, %v828_v57   ;;  %v399_v19 = vld [vmem:[#allocation6 + $0xe8] sm:$0xff]  ;;  %v374_v22 = vld [vmem:[#allocation6 + $0x20] sm:$0xff]  ;;  %v393_v56 = vld [vmem:[#allocation6 + $0xb8] sm:$0xff] }
  0xe1   : > { %v392_v57 = vld [vmem:[#allocation6 + $0xb0] sm:$0xff] }
  0xe2   : > { %1328 = vmatpush1.bf16.msra.mxu0 %v1327_v23  ;;  %v800_v31 = vadd.f32 %v799_v27, %v769_v24  ;;  %1402 = vmatpush1.bf16.msra.mxu1 %v1327_v23  ;;  %v398_v23 = vld [vmem:[#allocation6 + $0xe0] sm:$0xff]  ;;  %v377_v24 = vld [vmem:[#allocation6 + $0x38] sm:$0xff] }
  0xe3   : > { %1329 = vmatprep.subr.bf16.mxu0 %v1781_v0  ;;  %1387 = vmatprep.subr.bf16.mxu1 %v1781_v0  ;;  %v992_v27 = vld [vmem:[#allocation12 + $0x20] sm:$0xff] }
  0xe4   : > { %v801_v36 = vadd.f32 %v800_v31, %v770_v28  ;;  %847 = vperm.xlu0 %1511, %v829_v2   ;;  %852 = vperm.xlu1 %1512, %v830_v3   ;;  %v376_v28 = vld [vmem:[#allocation6 + $0x30] sm:$0xff]  ;;  %v403_v31 = vld [vmem:[#allocation6 + $0x108] sm:$0xff] }
  0xe6   : > { %1331 = vmatpush1.bf16.msra.mxu0 %v1330_v32  ;;  %v802_v40 = vadd.f32 %v801_v36, %v771_v33  ;;  %1403 = vmatpush1.bf16.msra.mxu1 %v1330_v32  ;;  %v834_v32 = vld [vmem:[#allocation11 + $0x38] sm:$0xff]  ;;  %v993_v33 = vld [vmem:[#allocation12 + $0x28] sm:$0xff] }
  0xe7   : > { %1332 = vmatprep.subr.bf16.mxu0 %v1781_v0  ;;  %1388 = vmatprep.subr.bf16.mxu1 %v1781_v0  ;;  %v381_v36 = vld [vmem:[#allocation6 + $0x58] sm:$0xff] }
  0xe8   : > { %v803_v45 = vadd.f32 %v802_v40, %v772_v37  ;;  %998 = vperm.xlu0 %1511, %v988_v8   ;;  %1003 = vperm.xlu1 %1512, %v989_v9   ;;  %v405_v37 = vld [vmem:[#allocation6 + $0x118] sm:$0xff]  ;;  %v380_v40 = vld [vmem:[#allocation6 + $0x50] sm:$0xff] }
  0xea   : > { %1334 = vmatpush1.bf16.msra.mxu0 %v1333_v41  ;;  %v804_v49 = vadd.f32 %v803_v45, %v773_v42  ;;  %1404 = vmatpush1.bf16.msra.mxu1 %v1333_v41  ;;  %v404_v41 = vld [vmem:[#allocation6 + $0x110] sm:$0xff]  ;;  %v383_v42 = vld [vmem:[#allocation6 + $0x68] sm:$0xff]  ;;  %v406_v45 = vld [vmem:[#allocation6 + $0x120] sm:$0xff] }
  0xeb   : > { %1335 = vmatprep.subr.bf16.mxu0 %v1781_v0  ;;  %1389 = vmatprep.subr.bf16.mxu1 %v1781_v0 }
  0xec   : > { %v805_v54 = vadd.f32 %v804_v49, %v774_v46  ;;  %857 = vperm.xlu0 %1511, %v831_v15   ;;  %1008 = vperm.xlu1 %1512, %v990_v16   ;;  %v385_v46 = vld [vmem:[#allocation6 + $0x78] sm:$0xff]  ;;  %v408_v49 = vld [vmem:[#allocation6 + $0x130] sm:$0xff] }
  0xee   : > { %1337 = vmatpush1.bf16.msra.mxu0 %v1336_v50  ;;  %v806_v58 = vadd.f32 %v805_v54, %v775_v51  ;;  %1405 = vmatpush1.bf16.msra.mxu1 %v1336_v50  ;;  %v387_v50 = vld [vmem:[#allocation6 + $0x88] sm:$0xff]  ;;  %v386_v51 = vld [vmem:[#allocation6 + $0x80] sm:$0xff] }
  0xef   : > { %1338 = vmatprep.subr.bf16.mxu0 %v1781_v0  ;;  %1390 = vmatprep.subr.bf16.mxu1 %v1781_v0  ;;  %v391_v54 = vld [vmem:[#allocation6 + $0xa8] sm:$0xff] }
  0xf0   : > { %v807_v63 = vadd.f32 %v806_v58, %v776_v55  ;;  %862 = vperm.xlu0 %1511, %v832_v20   ;;  %1013 = vperm.xlu1 %1512, %v991_v21   ;;  %v390_v55 = vld [vmem:[#allocation6 + $0xa0] sm:$0xff] }
  0xf1   : > { %v819_v58 = vld [vmem:[#allocation9] sm:$0xff] }
  0xf2   : > { %1340 = vmatpush1.bf16.msra.mxu0 %v1339_v59  ;;  %v808_v4 = vadd.f32 %v807_v63, %v777_v60  ;;  %1406 = vmatpush1.bf16.msra.mxu1 %v1339_v59 }
  0xf3   : > { %1341 = vmatprep.subr.bf16.mxu0 %v1781_v0  ;;  %1391 = vmatprep.subr.bf16.mxu1 %v1781_v0  ;;  %v372_v0 = vld [vmem:[#allocation6 + $0x10] sm:$0xff] }
  0xf4   : > { %v809_v7 = vadd.f32 %v808_v4, %v778_v1  ;;  %867 = vperm.xlu0 %1511, %v833_v26   ;;  %1018 = vperm.xlu1 %1512, %v992_v27  }
  0xf6   : > { %1343 = vmatpush1.bf16.msra.mxu0 %v1342_v5  ;;  %v2142_v10 = vadd.f32 %v809_v7, %v779_v6  ;;  %1407 = vmatpush1.bf16.msra.mxu1 %v1342_v5 }
  0xf8   : > { %872 = vperm.xlu0 %1511, %v834_v32   ;;  %1023 = vperm.xlu1 %1512, %v993_v33  }
  0xf9   : > { %507 = vmatmul.mubr.f32.vlgmr.msra.gmra.mrb[0].mxu0 %v370_v11  ;;  %567 = vmatmul.mubr.f32.vlgmr.msra.gmra.mrb[0].mxu1 %v394_v12  ;;  %v811_v12 = vrot.slane %v2142_v10, 4 }
  0xfa   : > { %511 = vmatprep.mubr.f32.mxu0 %v373_v13  ;;  %571 = vmatprep.mubr.f32.mxu1 %v397_v14 }
  0xfc   : > { %1028 = vperm.xlu0 %1511, %v994_v38   ;;  %1033 = vperm.xlu1 %1512, %v995_v39  }
  0xfd   : > { %512 = vmatmul.mubr.f32.gmra.mrb[2].mxu0 %v372_v0  ;;  %572 = vmatmul.mubr.f32.gmra.mrb[2].mxu1 %v396_v17 }
  0xfe   : > { %516 = vmatprep.mubr.f32.mxu0 %v375_v18  ;;  %576 = vmatprep.mubr.f32.mxu1 %v399_v19 }
 0x101   : > { %517 = vmatmul.mubr.f32.gmra.mrb[4].mxu0 %v374_v22  ;;  %577 = vmatmul.mubr.f32.gmra.mrb[4].mxu1 %v398_v23  ;;  %v812_v23 = vadd.f32 %v811_v12, %v2142_v10 }
 0x102   : > { %521 = vmatprep.mubr.f32.mxu0 %v377_v24  ;;  %581 = vmatprep.mubr.f32.mxu1 %v401_v25 }
 0x103   : > { %v813_v33 = vrot.slane %v812_v23, 2 }
 0x105   : > { %522 = vmatmul.mubr.f32.gmra.mrb[6].mxu0 %v376_v28  ;;  %582 = vmatmul.mubr.f32.gmra.mrb[6].mxu1 %v400_v29 }
 0x106   : > { %526 = vmatprep.mubr.f32.mxu0 %v379_v30  ;;  %586 = vmatprep.mubr.f32.mxu1 %v403_v31 }
 0x109   : > { %527 = vmatmul.mubr.f32.gmra.mrb[8].mxu0 %v378_v34  ;;  %587 = vmatmul.mubr.f32.gmra.mrb[8].mxu1 %v402_v35 }
 0x10a   : > { %531 = vmatprep.mubr.f32.mxu0 %v381_v36  ;;  %591 = vmatprep.mubr.f32.mxu1 %v405_v37 }
 0x10d   : > { %532 = vmatmul.mubr.f32.gmra.mrb[10].mxu0 %v380_v40  ;;  %592 = vmatmul.mubr.f32.gmra.mrb[10].mxu1 %v404_v41 }
 0x10e   : > { %536 = vmatprep.mubr.f32.mxu0 %v383_v42  ;;  %596 = vmatprep.mubr.f32.mxu1 %v407_v43  ;;  %v814_v43 = vadd.f32 %v813_v33, %v812_v23 }
 0x111   : > { %537 = vmatmul.mubr.f32.gmra.mrb[12].mxu0 %v382_v44  ;;  %597 = vmatmul.mubr.f32.gmra.mrb[12].mxu1 %v406_v45 }
 0x112   : > { %541 = vmatprep.mubr.f32.mxu0 %v385_v46  ;;  %601 = vmatprep.mubr.f32.mxu1 %v409_v47 }
 0x115   : > { %542 = vmatmul.mubr.f32.gmra.mrb[14].mxu0 %v384_v48  ;;  %602 = vmatmul.mubr.f32.gmra.mrb[14].mxu1 %v408_v49 }
 0x116   : > { %546 = vmatprep.mubr.f32.mxu0 %v387_v50  ;;  %1284 = vmatprep.mubr.f32.mxu1 %v819_v58 }
 0x119   : > { %547 = vmatmul.mubr.f32.gmra.mrb[16].mxu0 %v386_v51 }
 0x11a   : > { %551 = vmatprep.mubr.f32.mxu0 %v389_v52 }
 0x11d   : > { %552 = vmatmul.mubr.f32.gmra.mrb[18].mxu0 %v388_v53 }
 0x11e   : > { %556 = vmatprep.mubr.f32.mxu0 %v391_v54  ;;  %v815_v54 = vrot.slane %v814_v43, 1 }
 0x121   : > { %557 = vmatmul.mubr.f32.gmra.mrb[20].mxu0 %v390_v55 }
 0x122   : > { %561 = vmatprep.mubr.f32.mxu0 %v393_v56 }
 0x125   : > { %562 = vmatmul.mubr.f32.gmra.mrb[22].mxu0 %v392_v57 }
 0x13f   : > { %v626_v59 = vpop.permute.xlu0 %625  ;;  %v2144_v60 = vpop.permute.xlu1 %635 }
 0x143   : > { %v631_v61 = vpop.permute.xlu0 %630  ;;  %v2146_v62 = vpop.permute.xlu1 %640 }
 0x147   : > { %v2148_v63 = vpop.permute.xlu0 %645  ;;  %v2150_v1 = vpop.permute.xlu1 %650 }
 0x14b   : > { %v2152_v2 = vpop.permute.xlu0 %655  ;;  %v2154_v3 = vpop.permute.xlu1 %660 }
 0x14f   : > { %v666_v4 = vpop.permute.xlu0 %665  ;;  %v671_v11 = vpop.permute.xlu1 %670 }
 0x153   : > { %v676_v20 = vpop.permute.xlu0 %675  ;;  %v681_v31 = vpop.permute.xlu1 %680 }
 0x157   : > { %v686_v41 = vpop.permute.xlu0 %685  ;;  %v691_v51 = vpop.permute.xlu1 %690 }
 0x1cc   : > { %v508_v5 = vpop.f32.mrb[0].mxu0  ;;  %v568_v6 = vpop.f32.mrb[0].mxu1 }
 0x1cd   : > { %v510_v7 = vpop.f32.mrb[1].mxu0  ;;  %v711_v8 = vadd.f32 %v666_v4, %v568_v6  ;;  %v570_v9 = vpop.f32.mrb[1].mxu1  ;;  %v735_v15 = vmul.f32 %v508_v5, %v508_v5 }
 0x1cf   : > { %v727_v17 = vmax.f32 %v711_v8, 0.0  ;;  %v696_v8 = vpop.permute.xlu0 %695 }
 0x1d0   : > { %v513_v13 = vpop.f32.mrb[2].mxu0  ;;  %v573_v14 = vpop.f32.mrb[2].mxu1 }
 0x1d1   : > { %v736_v16 = vmul.f32 %v513_v13, %v513_v13  ;;  %v515_v0 = vpop.f32.mrb[3].mxu0  ;;  %v712_v18 = vadd.f32 %v671_v11, %v573_v14  ;;  %v575_v19 = vpop.f32.mrb[3].mxu1 }
 0x1d2   : > { %v2162_v0 = vadd.f32 %v815_v54, %v814_v43  ;;  %v825_v54 = vld [vmem:[#allocation9 + $0x30] sm:$0xff] }
 0x1d3   : > { %v739_v21 = vadd.f32 %v736_v16, %v735_v15  ;;  %v728_v22 = vmax.f32 %v712_v18, 0.0 }
 0x1d4   : > { %v518_v24 = vpop.f32.mrb[4].mxu0  ;;  %v578_v25 = vpop.f32.mrb[4].mxu1 }
 0x1d5   : > { %v737_v26 = vmul.f32 %v518_v24, %v518_v24  ;;  %v520_v27 = vpop.f32.mrb[5].mxu0  ;;  %v2158_v28 = vpack.c.bf16 %v728_v22, %v727_v17  ;;  %v713_v29 = vadd.f32 %v676_v20, %v578_v25  ;;  %v580_v30 = vpop.f32.mrb[5].mxu1 }
 0x1d7   : > { %v740_v32 = vadd.f32 %v739_v21, %v737_v26  ;;  %v729_v38 = vmax.f32 %v713_v29, 0.0 }
 0x1d8   : > { %v523_v34 = vpop.f32.mrb[6].mxu0  ;;  %v583_v35 = vpop.f32.mrb[6].mxu1 }
 0x1d9   : > { %v738_v36 = vmul.f32 %v523_v34, %v523_v34  ;;  %v525_v37 = vpop.f32.mrb[7].mxu0  ;;  %v714_v39 = vadd.f32 %v681_v31, %v583_v35  ;;  %v585_v40 = vpop.f32.mrb[7].mxu1 }
 0x1db   : > { %v741_v10 = vadd.f32 %v740_v32, %v738_v36  ;;  %v730_v42 = vmax.f32 %v714_v39, 0.0 }
 0x1dc   : > { %v528_v44 = vpop.f32.mrb[8].mxu0  ;;  %v588_v45 = vpop.f32.mrb[8].mxu1 }
 0x1dd   : > { %v742_v46 = vrot.slane %v741_v10, 4  ;;  %v530_v47 = vpop.f32.mrb[9].mxu0  ;;  %v2160_v48 = vpack.c.bf16 %v730_v42, %v729_v38  ;;  %v715_v49 = vadd.f32 %v686_v41, %v588_v45  ;;  %v590_v50 = vpop.f32.mrb[9].mxu1  ;;  %v703_v53 = vadd.f32 %v626_v59, %v528_v44 }
 0x1df   : > { %v743_v52 = vadd.f32 %v742_v46, %v741_v10  ;;  %v731_v5 = vmax.f32 %v715_v49, 0.0  ;;  %v719_v11 = vmax.f32 %v703_v53, 0.0  ;;  %v824_v53 = vld [vmem:[#allocation9 + $0x28] sm:$0xff] }
 0x1e0   : > { %v533_v55 = vpop.f32.mrb[10].mxu0  ;;  %v593_v56 = vpop.f32.mrb[10].mxu1 }
 0x1e1   : > { %v744_v57 = vrot.slane %v743_v52, 2  ;;  %v704_v58 = vadd.f32 %v631_v61, %v533_v55  ;;  %v535_v4 = vpop.f32.mrb[11].mxu0  ;;  %v716_v6 = vadd.f32 %v691_v51, %v593_v56  ;;  %v595_v7 = vpop.f32.mrb[11].mxu1 }
 0x1e2   : > { %v701_v61 = vpop.permute.xlu1 %700  ;;  %v838_v55 = vpop.permute.xlu0 %837 }
 0x1e3   : > { %v745_v9 = vadd.f32 %v744_v57, %v743_v52  ;;  %v720_v12 = vmax.f32 %v704_v58, 0.0  ;;  %v732_v13 = vmax.f32 %v716_v6, 0.0  ;;  %v823_v52 = vld [vmem:[#allocation9 + $0x20] sm:$0xff] }
 0x1e4   : > { %v538_v14 = vpop.f32.mrb[12].mxu0  ;;  %v598_v15 = vpop.f32.mrb[12].mxu1 }
 0x1e5   : > { %v746_v16 = vrot.slane %v745_v9, 1  ;;  %v1344_v59 = vpack.c.bf16 %v720_v12, %v719_v11  ;;  %v1368_v17 = vpack.c.bf16 %v732_v13, %v731_v5  ;;  %v540_v18 = vpop.f32.mrb[13].mxu0  ;;  %v600_v19 = vpop.f32.mrb[13].mxu1  ;;  %v717_v20 = vadd.f32 %v696_v8, %v598_v15 }
 0x1e6   : > { %v705_v22 = vadd.f32 %v2144_v60, %v538_v14  ;;  %v848_v56 = vpop.permute.xlu0 %847 }
 0x1e7   : > { %v2164_v21 = vadd.f32 %v746_v16, %v745_v9  ;;  %1345 = vmatprep.subr.bf16.mxu1 %v1344_v59  ;;  %v733_v26 = vmax.f32 %v717_v20, 0.0 }
 0x1e8   : > { %v543_v23 = vpop.f32.mrb[14].mxu0  ;;  %v603_v24 = vpop.f32.mrb[14].mxu1  ;;  %1347 = vmatpush3.bf16.msra.mxu1 %v1344_v59  ;;  %v721_v32 = vmax.f32 %v705_v22, 0.0 }
 0x1e9   : > { %v817_v25 = vsub.f32 %v2164_v21, %v2162_v0  ;;  %v706_v27 = vadd.f32 %v2146_v62, %v543_v23  ;;  %v718_v29 = vadd.f32 %v701_v61, %v603_v24  ;;  %v545_v30 = vpop.f32.mrb[15].mxu0  ;;  %v605_v31 = vpop.f32.mrb[15].mxu1 }
 0x1ea   : > { %v999_v58 = vpop.permute.xlu0 %998 }
 0x1eb   : > { %v722_v33 = vmax.f32 %v706_v27, 0.0  ;;  %v734_v34 = vmax.f32 %v718_v29, 0.0 }
 0x1ec   : > { %v548_v35 = vpop.f32.mrb[16].mxu0 }
 0x1ed   : > { %v1348_v36 = vpack.c.bf16 %v722_v33, %v721_v32  ;;  %v1372_v37 = vpack.c.bf16 %v734_v34, %v733_v26  ;;  %v550_v60 = vpop.f32.mrb[17].mxu0  ;;  %v707_v38 = vadd.f32 %v2148_v63, %v548_v35 }
 0x1ee   : > { %v858_v5 = vpop.permute.xlu0 %857 }
 0x1ef   : > { %1349 = vmatprep.subr.bf16.mxu1 %v1348_v36  ;;  %v723_v10 = vmax.f32 %v707_v38, 0.0 }
 0x1f0   : > { %v553_v39 = vpop.f32.mrb[18].mxu0  ;;  %1351 = vmatpush3.bf16.msra.mxu1 %v1348_v36 }
 0x1f1   : > { %v708_v40 = vadd.f32 %v2150_v1, %v553_v39  ;;  %v555_v41 = vpop.f32.mrb[19].mxu0  ;;  %v820_v1 = vld [vmem:[#allocation9 + $0x8] sm:$0xff] }
 0x1f2   : > { %v863_v7 = vpop.permute.xlu0 %862 }
 0x1f3   : > { %v724_v62 = vmax.f32 %v708_v40, 0.0 }
 0x1f4   : > { %v558_v42 = vpop.f32.mrb[20].mxu0 }
 0x1f5   : > { %v1352_v43 = vpack.c.bf16 %v724_v62, %v723_v10  ;;  %v560_v44 = vpop.f32.mrb[21].mxu0  ;;  %v709_v45 = vadd.f32 %v2152_v2, %v558_v42  ;;  %v821_v2 = vld [vmem:[#allocation9 + $0x10] sm:$0xff] }
 0x1f6   : > { %v868_v59 = vpop.permute.xlu0 %867 }
 0x1f7   : > { %1353 = vmatprep.subr.bf16.mxu1 %v1352_v43  ;;  %v725_v63 = vmax.f32 %v709_v45, 0.0 }
 0x1f8   : > { %v563_v46 = vpop.f32.mrb[22].mxu0  ;;  %1355 = vmatpush3.bf16.msra.mxu1 %v1352_v43 }
 0x1f9   : > { %v710_v47 = vadd.f32 %v2154_v3, %v563_v46  ;;  %v565_v49 = vpop.f32.mrb[23].mxu0  ;;  %v822_v3 = vld [vmem:[#allocation9 + $0x18] sm:$0xff] }
 0x1fa   : > { %v873_v33 = vpop.permute.xlu0 %872 }
 0x1fb   : > { %v726_v50 = vmax.f32 %v710_v47, 0.0 }
 0x1fd   : > { %v1356_v51 = vpack.c.bf16 %v726_v50, %v725_v63 }
 0x1fe   : > { %v1029_v46 = vpop.permute.xlu0 %1028 }
 0x1ff   : > { %1357 = vmatprep.subr.bf16.mxu1 %v1356_v51 }
 0x200   : > { %1359 = vmatpush3.bf16.msra.mxu1 %v1356_v51 }
 0x201   : > { %1361 = vmatprep.subr.bf16.mxu1 %v2158_v28 }
 0x204   : > { %1363 = vmatpush3.bf16.msra.mxu1 %v2158_v28  ;;  %v826_v28 = vld [vmem:[#allocation9 + $0x38] sm:$0xff] }
 0x205   : > { %1365 = vmatprep.subr.bf16.mxu1 %v2160_v48 }
 0x208   : > { %1367 = vmatpush3.bf16.msra.mxu1 %v2160_v48  ;;  %v843_v48 = vpop.permute.xlu1 %842 }
 0x209   : > { %1369 = vmatprep.subr.bf16.mxu1 %v1368_v17 }
 0x20c   : > { %1371 = vmatpush3.bf16.msra.mxu1 %v1368_v17  ;;  %v853_v57 = vpop.permute.xlu1 %852 }
 0x20d   : > { %1373 = vmatprep.subr.bf16.mxu1 %v1372_v37 }
 0x210   : > { %1375 = vmatpush3.bf16.msra.mxu1 %v1372_v37  ;;  %v1004_v4 = vpop.permute.xlu1 %1003 }
 0x213   : > { %1285 = vmatmul.mubr.f32.vlgmr.msra.gmra.mrb[16].mxu1 %v820_v1 }
 0x214   : > { %1287 = vmatprep.mubr.f32.mxu1 %v821_v2  ;;  %v1009_v6 = vpop.permute.xlu1 %1008 }
 0x217   : > { %1288 = vmatmul.mubr.f32.gmra.mrb[18].mxu1 %v822_v3 }
 0x218   : > { %1290 = vmatprep.mubr.f32.mxu1 %v823_v52  ;;  %v1014_v9 = vpop.permute.xlu1 %1013 }
 0x21b   : > { %1291 = vmatmul.mubr.f32.gmra.mrb[20].mxu1 %v824_v53 }
 0x21c   : > { %1293 = vmatprep.mubr.f32.mxu1 %v825_v54  ;;  %v1019_v22 = vpop.permute.xlu1 %1018 }
 0x21f   : > { %1294 = vmatmul.mubr.f32.gmra.mrb[22].mxu1 %v826_v28  ;;  %v1058_v28 = vstv %s1057_s8 }
 0x220   : > { %v1024_v38 = vpop.permute.xlu1 %1023 }
 0x224   : > { %v1034_v63 = vpop.permute.xlu1 %1033 }
 0x2e6   : > { %v1286_v8 = vpop.f32.mrb[16].mxu1 }
 0x2e7   : > { %v947_v11 = vadd.f32 %v1286_v8, %v843_v48  ;;  %v941_v12 = vpop.f32.mrb[17].mxu1 }
 0x2e8   : > { %v942_v13 = vadd.f32 %v941_v12, %v838_v55 }
 0x2e9   : > { %v981_v14 = vmax.f32 %v947_v11, 0.0 }
 0x2ea   : > { %v980_v15 = vmax.f32 %v942_v13, 0.0  ;;  %v1289_v16 = vpop.f32.mrb[18].mxu1 }
 0x2eb   : > { %v1037_v17 = vmul.f32 %v1004_v4, %v981_v14  ;;  %v957_v18 = vadd.f32 %v1289_v16, %v853_v57  ;;  %v951_v19 = vpop.f32.mrb[19].mxu1 }
 0x2ec   : > { %v1036_v20 = vmul.f32 %v999_v58, %v980_v15  ;;  %v952_v61 = vadd.f32 %v951_v19, %v848_v56 }
 0x2ed   : > { %v983_v24 = vmax.f32 %v957_v18, 0.0 }
 0x2ee   : > { %v1044_v23 = vadd.f32 %v1037_v17, %v1036_v20  ;;  %v982_v26 = vmax.f32 %v952_v61, 0.0  ;;  %v1292_v27 = vpop.f32.mrb[20].mxu1 }
 0x2ef   : > { %v967_v29 = vadd.f32 %v1292_v27, %v863_v7  ;;  %v961_v30 = vpop.f32.mrb[21].mxu1  ;;  %v1039_v34 = vmul.f32 %v1014_v9, %v983_v24 }
 0x2f0   : > { %v1038_v31 = vmul.f32 %v1009_v6, %v982_v26  ;;  %v962_v32 = vadd.f32 %v961_v30, %v858_v5  ;;  %v818_v5 = vmul.f32 0.5, %v817_v25 }
 0x2f1   : > { %v985_v36 = vmax.f32 %v967_v29, 0.0 }
 0x2f2   : > { %v1045_v35 = vadd.f32 %v1044_v23, %v1038_v31  ;;  %v984_v37 = vmax.f32 %v962_v32, 0.0  ;;  %v1295_v60 = vpop.f32.mrb[22].mxu1 }
 0x2f3   : > { %v977_v39 = vadd.f32 %v1295_v60, %v873_v33  ;;  %v971_v40 = vpop.f32.mrb[23].mxu1  ;;  %v1041_v42 = vmul.f32 %v1024_v38, %v985_v36 }
 0x2f4   : > { %v1040_v41 = vmul.f32 %v1019_v22, %v984_v37  ;;  %v1046_v10 = vadd.f32 %v1045_v35, %v1039_v34  ;;  %v972_v62 = vadd.f32 %v971_v40, %v868_v59 }
 0x2f5   : > { %v987_v44 = vmax.f32 %v977_v39, 0.0 }
 0x2f6   : > { %v1047_v43 = vadd.f32 %v1046_v10, %v1040_v41  ;;  %v986_v45 = vmax.f32 %v972_v62, 0.0 }
 0x2f7   : > { %v1043_v50 = vmul.f32 %v1034_v63, %v987_v44 }
 0x2f8   : > { %v1042_v47 = vmul.f32 %v1029_v46, %v986_v45  ;;  %v1048_v49 = vadd.f32 %v1047_v43, %v1041_v42 }
 0x2fa   : > { %v1049_v51 = vadd.f32 %v1048_v49, %v1042_v47 }
 0x2fc   : > { %v1050_v1 = vadd.f32 %v1049_v51, %v1043_v50 }
 0x2fe   : > { %v1051_v2 = vrot.slane %v1050_v1, 4 }
 0x300   : > { %v1052_v3 = vadd.f32 %v1051_v2, %v1050_v1 }
 0x302   : > { %v1053_v52 = vrot.slane %v1052_v3, 2 }
 0x304   : > { %v1054_v53 = vadd.f32 %v1053_v52, %v1052_v3 }
 0x306   : > { %v1055_v54 = vrot.slane %v1054_v53, 1 }
 0x308   : > { %v1056_v55 = vadd.f32 %v1055_v54, %v1054_v53 }
 0x30a   : > { %v1059_v48 = vadd.f32 %v1058_v28, %v1056_v55 }
 0x30c   : > { %v1060_v56 = vsub.f32 0.0, %v1059_v48 }
 0x30e   : > { %v1061_v57 = vmul.f32 1.442695, %v1060_v56 }
 0x310   : > { %1513 = vpow2.f32 %v1061_v57 }
 0x31a   : > { %v1514_v58 = vpop.eup %1513 }
 0x31b   : > { %v1063_v4 = vadd.f32 1.0, %v1514_v58 }
 0x31d   : > { %1515 = vrcp.f32 %v1063_v4 }
 0x327   : > { %v1516_v6 = vpop.eup %1515 }
 0x328   : > { %v1066_v7 = vadd.f32 %v1516_v6, %v818_v5 }
 0x32a   : > { %v1067_v8 = vsub.f32 0.0, %v1066_v7 }
 0x32c   : > { %v1068_v9 = vmul.f32 1.442695, %v1067_v8 }
 0x32e   : > { %1517 = vpow2.f32 %v1068_v9 }
 0x338   : > { %v1518_v11 = vpop.eup %1517 }
 0x339   : > { %v1070_v12 = vadd.f32 1.0, %v1518_v11 }
 0x33b   : > { %1519 = vrcp.f32 %v1070_v12 }
 0x345   : > { %v1520_v0 = vpop.eup %1519 }
 0x346   : > { %1073 = vst [vmem:[%s369_s11] sm:$0xff] %v1520_v0 }
 0x347   : > { %1704 = shalt.err (!%p1701_p5)
}
 0x348   : > { %s1705_s19 = scalar_lea.hbm %s2186_s17, 128  ;;  %s1709_s18 = scalar_lea.hbm %s2237_s7, 256 }
 0x349   : > { %p1706_p11 = scmp.ne.s32.totalorder %s2186_s17, %s1705_s19  ;;  %p1710_p4 = scmp.lt.u32.totalorder %s2186_s17, %s2237_s7 }
 0x34a   : > { %p1711_p6 = scmp.lt.u32.totalorder %s1709_s18, %s1705_s19  ;;  %p1713_p12 = scmp.lt.u32.totalorder %s1705_s19, %s2186_s17 }
 0x34b   : > { %p1707_p1 = pnand %p1706_p11, %p2005_p10 }
 0x34c   : > { %p1712_p8 = por %p1711_p6, %p1710_p4 }
 0x34d   : > { %p1708_p2 = pneg %p1707_p1 }
 0x34e   : > { %p1714_p3 = por %p1713_p12, %p1712_p8 }
 0x350   : > { %p1715_p7 = pnand %p1714_p3, %p1708_p2 }
 0x352   : > { %1718 = shalt.err (!%p1715_p7)
}
 0x353   : > { %1430 = dma.vmem_to_hbm [thread:$0]  (%p2005_p10), %s2188_s24, 128, %s2186_s17, %s1075_s12  }
 0x354 PF: > { %s2261_s30 = sld [smem:[#allocation20_spill]]  ;;  %s1100_s11 = sand.u32 1, %s1757_s26  }
 0x355   : > { %p2263_p13 = scmp.ge.s32.totalorder %s1769_s29, 2  ;;  %s1101_s15 = scalar_lea.sflag [#allocation5], %s1100_s11 }
 0x35a   : > { %p2262_p9 = scmp.ne.s32.totalorder %s2261_s30, 0 }
 0x35c   : > { %p1453_p0 = pnand %p2263_p13, %p2262_p9 }
 0x35e   : > { %1752 = dma.done.wait (!%p1453_p0), %s1101_s15, 128  }
 0x35f   : > { %1754 = vsyncadd (!%p1453_p0), %s1101_s15, 4294967168  ;;  %p24_p5 = scmp.ge.s32.totalorder %s1991_s21, 4   ;;  %s2264_s26 = smov %s1761_s27 }
 0x360   : > { %s2265_s27 = smov %s1765_s28  ;;  %s2266_s28 = smov %s2001_s9 }
 0x361   : > { %s2267_s29 = smov %s1991_s21  ;;  %26 = sbr.rel (!%p24_p5) target bundleno = 10 (0xa), region = 113 }
 0x368   :  { %1106 = vsyncpa [#allocation4], 1 }
 0x369   :  { %1108 = vsyncpa [#allocation4 + $0x1], 1 }
 0x36a   :  { %1109 = vsyncpa [#allocation7], 1 }
 0x36b   :  { %1110 = vsyncpa [#allocation10], 1 }
 0x36c   :  { %1111 = vsyncpa [#allocation13], 1 }
 0x36d   :  { %1112 = vsyncpa [#allocation5], 1 }
 0x36e   :  { %1114 = vsyncpa [#allocation5 + $0x1], 1 }

</bundles_post_ra>
